<compile_context>
chip_gen: v7x
topology: tpu7x:2x2x1
jax: 0.10.0
libtpu: 0.0.40
codegen_flags: <defaults>
</compile_context>

<pallas_src>
import jax
import jax.numpy as jnp
from jax import lax
from jax.experimental import pallas as pl
from jax.experimental.pallas import tpu as pltpu

BN_EPS = 1e-5            # torch.nn.BatchNorm2d default eps
LANES = 128              # vreg lane width
TILE_ROWS = 4096         # 4096 x 128 f32 = 2 MiB per streamed block
STRIP_ROWS = 256         # in-kernel reduction strip (caps vreg pressure)
FUSED_MAX_ROWS = 8192    # x <= 4 MiB -> single fused VMEM-resident kernel
NUM_CORE_SPLITS = 2      # leading "parallel" grid axis (v7x has 2 TCs/chip)


# ---------------------------------------------------------------------------
# Scalar folding (pure jnp/lax; usable both in-kernel and in the epilogue)
# ---------------------------------------------------------------------------
def _fold_scale_shift(sum_x, sum_sq, n, w, b, gamma, beta):
    mean_x = sum_x / n
    var_x = jnp.maximum(sum_sq / n - mean_x * mean_x, 0.0)
    mean_y = w * mean_x + b          # stats of y = w*x + b
    var_y = w * w * var_x
    inv_std = lax.rsqrt(var_y + BN_EPS)
    scale = w * gamma * inv_std
    shift = (b - mean_y) * gamma * inv_std + beta
    return scale, shift


# ---------------------------------------------------------------------------
# Kernels
# ---------------------------------------------------------------------------
def _fused_kernel(params_ref, x_ref, o_ref):
    """Single-pass path: stats + folded conv/BN affine with x resident in VMEM.

    params (SMEM f32): [conv_w, conv_b, bn_gamma, bn_beta, n_valid_elements]
    """
    x = x_ref[...]
    w, b = params_ref[0], params_ref[1]
    gamma, beta = params_ref[2], params_ref[3]
    n = params_ref[4]

    sum_x = jnp.sum(x)
    sum_sq = jnp.sum(x * x)
    scale, shift = _fold_scale_shift(sum_x, sum_sq, n, w, b, gamma, beta)
    o_ref[...] = x * scale + shift


def _make_reduce_kernel(tile_rows, strip_rows, tiles_per_core, total_rows):
    """Pass 1: per-core-split partial sum / sum-of-squares accumulators."""
    n_strips = tile_rows // strip_rows

    def kernel(x_ref, s_ref, sq_ref):
        c = pl.program_id(0)          # core-split index ("parallel")
        t = pl.program_id(1)          # tile index within the split ("arbitrary")

        @pl.when(t == 0)
        def _():
            s_ref[...] = jnp.zeros_like(s_ref)
            sq_ref[...] = jnp.zeros_like(sq_ref)

        # Rows of this logical tile that hold real data.  Rows past
        # `total_rows` (ragged last tile / clamped duplicate tiles) are
        # masked to exact zeros so they contribute nothing to the sums.
        tile_idx = c * tiles_per_core + t
        valid_rows = total_rows - tile_idx * tile_rows

        def body(k, carry):
            s, sq = carry
            off = pl.multiple_of(k * strip_rows, strip_rows)
            x = x_ref[pl.ds(off, strip_rows), :]
            ridx = lax.broadcasted_iota(jnp.int32, (strip_rows, LANES), 0) + off
            x = jnp.where(ridx < valid_rows, x, 0.0)
            return (s + jnp.sum(x, axis=0, keepdims=True),
                    sq + jnp.sum(x * x, axis=0, keepdims=True))

        init = (jnp.zeros((1, LANES), jnp.float32),
                jnp.zeros((1, LANES), jnp.float32))
        s, sq = lax.fori_loop(0, n_strips, body, init)
        s_ref[...] += s.reshape(1, 1, LANES)
        sq_ref[...] += sq.reshape(1, 1, LANES)

    return kernel


def _affine_kernel(params_ref, x_ref, o_ref):
    """Pass 2: out = x * scale + shift (conv + BN folded into one FMA)."""
    o_ref[...] = x_ref[...] * params_ref[0] + params_ref[1]


# ---------------------------------------------------------------------------
# Wrapper (jitted)
# ---------------------------------------------------------------------------
@jax.jit
def conv_bn_forward(x_nchw, conv_w, conv_b, bn_gamma, bn_beta):
    """Forward of the `Conv` module. x_nchw: float32 array of shape (N, 1, H, W)."""
    N, C, H, W = x_nchw.shape
    assert C == 1, "module is Conv2d(1, 1, 1); C must be 1"

    total = N * C * H * W
    rows = -(-total // LANES)            # ceil(total / 128)
    pad = rows * LANES - total           # 0 in the common aligned case

    x_flat = x_nchw.reshape(-1).astype(jnp.float32)
    if pad:  # only when total % 128 != 0; zeros do not affect the sums
        x_flat = jnp.pad(x_flat, (0, pad))
    x2d = x_flat.reshape(rows, LANES)

    w = jnp.asarray(conv_w, jnp.float32)
    b = jnp.asarray(conv_b, jnp.float32)
    gamma = jnp.asarray(bn_gamma, jnp.float32)
    beta = jnp.asarray(bn_beta, jnp.float32)
    n = jnp.asarray(total, jnp.float32)  # true element count (excludes padding)

    if rows <= FUSED_MAX_ROWS:
        # ---- Fused single-pass path: 1 HBM read + 1 HBM write of x. ----
        params = jnp.stack([w, b, gamma, beta, n])
        out2d = pl.pallas_call(
            _fused_kernel,
            out_shape=jax.ShapeDtypeStruct(x2d.shape, jnp.float32),
            in_specs=[
                pl.BlockSpec(memory_space=pltpu.MemorySpace.SMEM),
                pl.BlockSpec(memory_space=pltpu.MemorySpace.VMEM),
            ],
            out_specs=pl.BlockSpec(memory_space=pltpu.MemorySpace.VMEM),
        )(params, x2d)
    else:
        # ---- Pass 1: tiled reduction (sum, sum of squares) over x. ----
        num_tiles = -(-rows // TILE_ROWS)
        tiles_per_core = -(-num_tiles // NUM_CORE_SPLITS)
        last_tile = num_tiles - 1

        reduce_kernel = _make_reduce_kernel(TILE_ROWS, STRIP_ROWS,
                                            tiles_per_core, rows)
        s_part, sq_part = pl.pallas_call(
            reduce_kernel,
            out_shape=(
                jax.ShapeDtypeStruct((NUM_CORE_SPLITS, 1, LANES), jnp.float32),
                jax.ShapeDtypeStruct((NUM_CORE_SPLITS, 1, LANES), jnp.float32),
            ),
            grid=(NUM_CORE_SPLITS, tiles_per_core),
            in_specs=[pl.BlockSpec(
                (TILE_ROWS, LANES),
                lambda c, t: (jnp.minimum(c * tiles_per_core + t, last_tile), 0))],
            out_specs=(
                pl.BlockSpec((1, 1, LANES), lambda c, t: (c, 0, 0)),
                pl.BlockSpec((1, 1, LANES), lambda c, t: (c, 0, 0)),
            ),
            compiler_params=pltpu.CompilerParams(
                dimension_semantics=("parallel", "arbitrary")),
        )(x2d)

        # Tiny final combine + scalar folding (plain JAX, fused under jit).
        scale, shift = _fold_scale_shift(jnp.sum(s_part), jnp.sum(sq_part),
                                         n, w, b, gamma, beta)
        params = jnp.stack([scale, shift])

        # ---- Pass 2: tiled, pipelined fused FMA (HBM-bandwidth bound). ----
        out2d = pl.pallas_call(
            _affine_kernel,
            out_shape=jax.ShapeDtypeStruct(x2d.shape, jnp.float32),
            grid=(num_tiles,),
            in_specs=[
                pl.BlockSpec(memory_space=pltpu.MemorySpace.SMEM),   # 2 scalars
                pl.BlockSpec((TILE_ROWS, LANES), lambda i: (i, 0)),
            ],
            out_specs=pl.BlockSpec((TILE_ROWS, LANES), lambda i: (i, 0)),
            compiler_params=pltpu.CompilerParams(
                dimension_semantics=("parallel",)),
        )(params, x2d)

    out_flat = out2d.reshape(-1)
    if pad:
        out_flat = out_flat[:total]
    # TODO(synk): QuantStub/DeQuantStub are identities before convert() and the
    # BatchNorm running_mean/running_var training-time side effects are not
    # reproduced; neither affects the tensor returned by forward().
    return out_flat.reshape(N, C, H, W)


def _reference(x_nchw, conv_w, conv_b, bn_gamma, bn_beta):
    """Pure-JAX reference for correctness checking."""
    y = x_nchw * conv_w + conv_b
    mean = jnp.mean(y)
    var = jnp.mean((y - mean) ** 2)
    return (y - mean) * lax.rsqrt(var + BN_EPS) * bn_gamma + bn_beta


if __name__ == "__main__":
    key = jax.random.PRNGKey(0)
    x = jax.random.normal(key, (2, 1, 16, 16), dtype=jnp.float32)

    # Deterministic parameter initialization (synthetic, not a checkpoint).
    conv_w = 0.75    # Conv2d weight, shape (1, 1, 1, 1) -> scalar
    conv_b = -0.20   # Conv2d bias, shape (1,) -> scalar
    bn_gamma = 1.10  # BatchNorm2d weight, shape (1,) -> scalar
    bn_beta = 0.05   # BatchNorm2d bias, shape (1,) -> scalar

    out = conv_bn_forward(x, conv_w, conv_b, bn_gamma, bn_beta)
    out = jax.block_until_ready(out)

    ref = _reference(x, conv_w, conv_b, bn_gamma, bn_beta)
    assert out.shape == x.shape and out.dtype == jnp.float32
    assert jnp.allclose(out, ref, atol=2e-5, rtol=2e-5), "mismatch vs reference"

    print("KERNEL_OK")
</pallas_src>

<mosaic_0001>
module attributes {stable_mosaic.version = 11 : i64} {
  func.func @_fused_kernel(%arg0: memref<5xf32, #tpu.memory_space<smem>>, %arg1: memref<4x128xf32, #tpu.memory_space<vmem>>, %arg2: memref<4x128xf32, #tpu.memory_space<vmem>>) attributes {dimension_semantics = [], scalar_prefetch = 0 : i64, scratch_operands = 0 : i64, tpu.core_type = #tpu.core_type<tc>} {
    %c0 = arith.constant 0 : index
    %c0_0 = arith.constant 0 : index
    %0 = vector.load %arg1[%c0, %c0_0] : memref<4x128xf32, #tpu.memory_space<vmem>>, vector<4x128xf32>
    %c0_1 = arith.constant 0 : index
    %1 = memref.load %arg0[%c0_1] : memref<5xf32, #tpu.memory_space<smem>>
    %c1 = arith.constant 1 : index
    %2 = memref.load %arg0[%c1] : memref<5xf32, #tpu.memory_space<smem>>
    %c2 = arith.constant 2 : index
    %3 = memref.load %arg0[%c2] : memref<5xf32, #tpu.memory_space<smem>>
    %c3 = arith.constant 3 : index
    %4 = memref.load %arg0[%c3] : memref<5xf32, #tpu.memory_space<smem>>
    %c4 = arith.constant 4 : index
    %5 = memref.load %arg0[%c4] : memref<5xf32, #tpu.memory_space<smem>>
    %6 = vector.shape_cast %0 : vector<4x128xf32> to vector<1x4x128xf32>
    %cst = arith.constant dense<0.000000e+00> : vector<1xf32>
    %7 = vector.multi_reduction <add>, %6, %cst [1, 2] : vector<1x4x128xf32> to vector<1xf32>
    %8 = vector.shape_cast %7 : vector<1xf32> to vector<1x1x1xf32>
    %9 = vector.extract %8[0, 0, 0] : f32 from vector<1x1x1xf32>
    %10 = arith.mulf %0, %0 : vector<4x128xf32>
    %11 = vector.shape_cast %10 : vector<4x128xf32> to vector<1x4x128xf32>
    %cst_2 = arith.constant dense<0.000000e+00> : vector<1xf32>
    %12 = vector.multi_reduction <add>, %11, %cst_2 [1, 2] : vector<1x4x128xf32> to vector<1xf32>
    %13 = vector.shape_cast %12 : vector<1xf32> to vector<1x1x1xf32>
    %14 = vector.extract %13[0, 0, 0] : f32 from vector<1x1x1xf32>
    %15 = arith.divf %9, %5 : f32
    %16 = arith.divf %14, %5 : f32
    %17 = arith.mulf %15, %15 : f32
    %18 = arith.subf %16, %17 : f32
    %cst_3 = arith.constant 0.000000e+00 : f32
    %19 = arith.maximumf %18, %cst_3 : f32
    %20 = arith.mulf %1, %15 : f32
    %21 = arith.addf %20, %2 : f32
    %22 = arith.mulf %1, %1 : f32
    %23 = arith.mulf %22, %19 : f32
    %cst_4 = arith.constant 9.99999974E-6 : f32
    %24 = arith.addf %23, %cst_4 : f32
    %25 = math.rsqrt %24 : f32
    %26 = arith.mulf %1, %3 : f32
    %27 = arith.mulf %26, %25 : f32
    %28 = arith.subf %2, %21 : f32
    %29 = arith.mulf %28, %3 : f32
    %30 = arith.mulf %29, %25 : f32
    %31 = arith.addf %30, %4 : f32
    %32 = vector.broadcast %27 : f32 to vector<4x128xf32>
    %33 = arith.mulf %0, %32 : vector<4x128xf32>
    %34 = vector.broadcast %31 : f32 to vector<4x128xf32>
    %35 = arith.addf %33, %34 : vector<4x128xf32>
    %c0_5 = arith.constant 0 : index
    %c0_6 = arith.constant 0 : index
    %36 = vector.load %arg2[%c0_5, %c0_6] : memref<4x128xf32, #tpu.memory_space<vmem>>, vector<4x128xf32>
    tpu.vector_store %arg2[%c0_5, %c0_6], %35 {strides = array<i32>} : memref<4x128xf32, #tpu.memory_space<vmem>>, vector<4x128xf32>,
    return
  }
}

</mosaic_0001>

<bundles_post_ra>
// kernel: conv_bn_forward.1
= control target key start
LH: loop header
LB: loop body
LE: loop exit
PB: predicated region body
PF: predicated region fallthrough
CT: control target
= control target key end

     0   :  { %7 = vsyncpa [#allocation3], 0  ;;  %s145_s0 = inlined_call_operand.vmem [shape: f32[5], index: 0, kind: input, shape index: {}]   ;;  %s146_s1 = inlined_call_operand.vmem [shape: f32[4,128], index: 1, kind: input, shape index: {}]   ;;  %s147_s2 = inlined_call_operand.vmem [shape: f32[4,128], index: 2, kind: output, shape index: {}]  }
   0x1   :  { %s14_s11 = sshll.u32 %s145_s0, 4  ;;  %s15_s11 = int_to_ptr.vmem [resolvable:$true] %s14_s11 }
   0x2   :  { %s105_s12 = scalar_lea.vmem %s15_s11, 16  ;;  %p110_p1 = scmp.lt.s32.totalorder %s15_s11, %s15_s11 }
   0x3   :  { %p106_p0 = scmp.ne.s32.totalorder %s15_s11, %s105_s12  ;;  %p111_p2 = scmp.lt.s32.totalorder %s105_s12, %s105_s12 }
   0x5   :  { %p112_p3 = por %p111_p2, %p110_p1 }
   0x7   :  { %p113_p4 = pnand %p112_p3, %p106_p0 }
   0x9   :  { %116 = shalt.err (!%p113_p4)
}
   0xa   :  { %s119_s13 = smov [#allocation2]  }
   0xb   :  { %17 = dma.vmem_to_smem %s15_s11, 16, %s119_s13, [#allocation3]  }
   0xc   :  { %117 = dma.done.wait [#allocation3], 16  }
   0xd   :  { %118 = vsyncadd [#allocation3], 4294967280 }
   0xe   :  { %23 = sfence }
   0xf   :  { %v24_v0 = vld [vmem:[%s146_s1] sm:$0xf]  ;;  %vm30_vm0 = vcmask 1043456   ;;  %s90_s0 = sld [smem:[#allocation2 + $0x4]]  ;;  %s25_s16 = sld [smem:[#allocation2]] }
  0x10   :  { %v31_v1 = vsel %vm30_vm0, %v24_v0, 0.0  ;;  %v41_v2 = vmul.f32 %v24_v0, %v24_v0  ;;  %s120_s24 = smov 0.0   ;;  %s87_s28 = sld [smem:[#allocation2 + $0x1]] }
  0x11   :  { %32 = vadd.xlane.f32.xlu0 %v31_v1  ;;  %s88_s30 = sld [smem:[#allocation2 + $0x2]]  ;;  %s89_s4 = sld [smem:[#allocation2 + $0x3]] }
  0x12   :  { %v42_v3 = vsel %vm30_vm0, %v41_v2, 0.0 }
  0x15   :  { %43 = vadd.xlane.f32.xlu0 %v42_v3  ;;  %v52_v6 = vstv %s90_s0  ;;  %s65_s22 = smul.f32 %s25_s16, %s25_s16 }
  0x16   :  { %101 = vrcp.f32 %v52_v6 }
  0x17   :  { %s71_s6 = smul.f32 %s88_s30, %s25_s16 }
  0x20   :  { %v102_v18 = vpop.eup %101 }
  0x9e   :  { %v33_v4 = vpop.xlane.xlu0 %32 }
  0x9f   :  { %v34_v5 = vrot.slane %v33_v4, 4 }
  0xa1   :  { %v35_v7 = vadd.f32 %v34_v5, %v33_v4 }
  0xa2   :  { %v44_v8 = vpop.xlane.xlu0 %43 }
  0xa3   :  { %v36_v9 = vrot.slane %v35_v7, 2  ;;  %v45_v10 = vrot.slane %v44_v8, 4 }
  0xa5   :  { %v46_v11 = vadd.f32 %v45_v10, %v44_v8  ;;  %v37_v12 = vadd.f32 %v36_v9, %v35_v7 }
  0xa7   :  { %v47_v13 = vrot.slane %v46_v11, 2  ;;  %v38_v14 = vrot.slane %v37_v12, 1 }
  0xa9   :  { %v48_v15 = vadd.f32 %v47_v13, %v46_v11  ;;  %v39_v16 = vadd.f32 %v38_v14, %v37_v12 }
  0xab   :  { %91 = vpush %v39_v16  ;;  %v49_v17 = vrot.slane %v48_v15, 1 }
  0xad   :  { %v50_v19 = vadd.f32 %v49_v17, %v48_v15 }
  0xaf   :  { %93 = vpush %v50_v19 }
  0xb0   :  { %95 = vpush %v102_v18 }
  0xdc   :  { %s92_s1 = spop %91 }
  0xe0   :  { %s94_s17 = spop %93 }
  0xe1   :  { %s96_s18 = spop %95 }
  0xe2   :  { %s55_s19 = smul.f32 %s96_s18, %s92_s1 }
  0xe3   :  { %s59_s20 = smul.f32 %s96_s18, %s94_s17 }
  0xe4   :  { %s60_s21 = smul.f32 %s55_s19, %s55_s19 }
  0xe5   :  { %s63_s29 = smul.f32 %s55_s19, %s25_s16 }
  0xe6   :  { %s61_s23 = ssub.f32 %s59_s20, %s60_s21 }
  0xe7   :  { %s64_s3 = sadd.f32 %s87_s28, %s63_s29 }
  0xe8   :  { %s62_s25 = smax.f32 %s120_s24, %s61_s23 }
  0xe9   :  { %s66_s26 = smul.f32 %s65_s22, %s62_s25  ;;  %s73_s5 = ssub.f32 %s87_s28, %s64_s3 }
  0xeb   :  { %s67_s27 = sadd.f32 1e-05, %s66_s26  ;;  %s74_s8 = smul.f32 %s88_s30, %s73_s5 }
  0xed   :  { %v68_v20 = vstv %s67_s27 }
  0xee   :  { %103 = vrsqrt.f32 %v68_v20 }
  0xf8   :  { %v104_v21 = vpop.eup %103 }
  0xf9   :  { %97 = vpush %v104_v21 }
 0x12a   :  { %s98_s7 = spop %97 }
 0x12b   :  { %s72_s9 = smul.f32 %s98_s7, %s71_s6 }
 0x12c   :  { %s75_s10 = smul.f32 %s98_s7, %s74_s8 }
 0x12d   :  { %v77_v22 = vstv %s72_s9 }
 0x12e   :  { %s76_s11 = sadd.f32 %s89_s4, %s75_s10  ;;  %v78_v23 = vmul.f32 %v77_v22, %v24_v0 }
 0x130   :  { %v79_v24 = vstv %s76_s11 }
 0x131   :  { %v80_v25 = vadd.f32 %v79_v24, %v78_v23 }
 0x133   :  { %81 = vst [vmem:[%s147_s2] sm:$0xf] %v80_v25 }
 0x134   :  { %86 = vsyncpa [#allocation3], 1 }

</bundles_post_ra>
